<compile_context>
chip_gen: v7x
topology: tpu7x:2x2x1
jax: 0.10.0
libtpu: 0.0.40
codegen_flags: <defaults>
</compile_context>

<pallas_src>
import functools

import jax
import jax.numpy as jnp
from jax import lax
from jax.experimental import pallas as pl
from jax.experimental.pallas import tpu as pltpu

_MIB = 1024 * 1024


# ---------------------------------------------------------------------------
# numerics helpers
# ---------------------------------------------------------------------------
def _sigmoid(x):
    # One EUP push (tanh) instead of exp + reciprocal (two pushes through the
    # single EUP slot).
    return 0.5 * (jnp.tanh(0.5 * x) + 1.0)


def _log_sigmoid(x):
    # logsigmoid(x) = min(x, 0) - log1p(exp(-|x|))   (numerically stable)
    return jnp.minimum(x, 0.0) - jnp.log1p(jnp.exp(-jnp.abs(x)))


# ---------------------------------------------------------------------------
# Pallas kernel: one (TM, N) row tile -> one partial-sum scalar
# ---------------------------------------------------------------------------
def _loss_kernel(logit_ref, *rest, loss_type, compute_dtype, use_diag_slab,
                 ragged, n_valid):
    if use_diag_slab:
        diag_ref, out_ref = rest
    else:
        (out_ref,) = rest

    cd = compute_dtype
    f32 = jnp.float32
    x = logit_ref[...].astype(cd)                    # (TM, N)
    tm, n = x.shape
    row_off = pl.program_id(0) * tm

    # --- positive (diagonal) logit for each row of this tile --------------
    if use_diag_slab:
        d = diag_ref[...].astype(cd)                 # (TM, TM) slab on the diag
        r = lax.broadcasted_iota(jnp.int32, d.shape, 0)
        c = lax.broadcasted_iota(jnp.int32, d.shape, 1)
        diag = jnp.sum(jnp.where(r == c, d, jnp.zeros_like(d)),
                       axis=1, keepdims=True)        # (TM, 1), exact (1 nonzero)
    else:
        r = lax.broadcasted_iota(jnp.int32, x.shape, 0)
        c = lax.broadcasted_iota(jnp.int32, x.shape, 1)
        diag = jnp.sum(jnp.where(c == r + row_off, x, jnp.zeros_like(x)),
                       axis=1, keepdims=True)        # (TM, 1)
    diag_cd = diag.astype(cd)
    diag_f32 = diag.astype(f32)

    # --- tail-row mask (only materialized for ragged batch sizes) ---------
    if ragged:
        valid = (lax.broadcasted_iota(jnp.int32, (tm, 1), 0) + row_off) < n_valid

        def mask_rows(v):
            return jnp.where(valid, v, jnp.zeros_like(v))
    else:
        def mask_rows(v):
            return v

    if loss_type == "TOP1":
        # mean(sigmoid(x - diag) + sigmoid(x^2))        (mean done in wrapper)
        f = _sigmoid(x - diag_cd) + _sigmoid(x * x)
        partial = jnp.sum(mask_rows(f.astype(f32)))

    elif loss_type == "BPR":
        # -mean(logsigmoid(diag - x))                   (negate+mean in wrapper)
        ls = _log_sigmoid(diag_cd - x)
        partial = jnp.sum(mask_rows(ls.astype(f32)))

    elif loss_type in ("TOP1-max", "BPR-max"):
        # per-row: sum_j softmax_ij * f_ij = sum_j(e_ij * f_ij) / sum_j(e_ij)
        x_max = jnp.max(x, axis=1, keepdims=True)
        e = jnp.exp(x - x_max)                            # softmax numerator
        if loss_type == "TOP1-max":
            f = _sigmoid(x - diag_cd) + _sigmoid(x * x)
        else:  # BPR-max; outer -log(mean(...)) applied once in the wrapper
            f = _sigmoid(diag_cd - x)
        num = jnp.sum((e * f).astype(f32), axis=1, keepdims=True)
        den = jnp.sum(e.astype(f32), axis=1, keepdims=True)
        partial = jnp.sum(mask_rows(num / den))           # exact (TM,1) divide

    elif loss_type == "XE":
        # CE(logit, arange(N)) == mean_i(logsumexp(row_i) - logit[i, i])
        x_max = jnp.max(x, axis=1, keepdims=True)
        den = jnp.sum(jnp.exp(x - x_max).astype(f32), axis=1, keepdims=True)
        lse = x_max.astype(f32) + jnp.log(den)
        partial = jnp.sum(mask_rows(lse - diag_f32))

    else:
        raise NotImplementedError(loss_type)

    # Lane-dense per-tile output block; every element holds the same partial.
    out_ref[...] = jnp.broadcast_to(partial, out_ref.shape).astype(jnp.float32)


# ---------------------------------------------------------------------------
# generation-aware planning
# ---------------------------------------------------------------------------
def _tpu_vmem_bytes():
    try:
        info = pltpu.get_tpu_info()
        v = getattr(info, "vmem_capacity_bytes", None)
        if v:
            return int(v)
    except Exception:
        pass
    return 64 * _MIB  # conservative default: v7x per-TensorCore VMEM


_TILE_CANDIDATES = (8192, 4096, 2048, 1024, 512, 256, 128, 64, 32, 16, 8)


def _pick_tile_rows(n, itemsize, tile_cap_bytes):
    """Largest sublane-aligned row tile whose (TM, N) block fits the cap."""
    cap_rows = max(8, tile_cap_bytes // max(1, itemsize * n))
    divisors = [t for t in _TILE_CANDIDATES
                if t <= cap_rows and t <= n and n % t == 0]
    if divisors:
        # prefer >=2 grid tiles so both v7x TensorCores get work
        multi = [t for t in divisors if n // t >= 2]
        return (multi[0] if multi else divisors[0]), False
    # Ragged batch: pad rows up to a multiple of 8 and mask the tail in-kernel
    # (never fall back to a full (N, N) block that could blow VMEM).
    n_pad = ((n + 7) // 8) * 8
    for t in _TILE_CANDIDATES:
        if t <= cap_rows and t <= n_pad:
            return t, True
    return 8, True


_TRANSCENDENTALS_PER_ELEM = {
    "TOP1": 2, "BPR": 2, "TOP1-max": 3, "BPR-max": 2, "XE": 1,
}


# ---------------------------------------------------------------------------
# Wrapper mirroring LossFunction(loss_type=...)
# ---------------------------------------------------------------------------
def loss_function(logit, loss_type="TOP1", tile_rows=None, compute_dtype=None):
    n, m = logit.shape
    assert n == m, "sampled losses expect a square (batch, batch) logit matrix"
    if loss_type not in _TRANSCENDENTALS_PER_ELEM:
        raise NotImplementedError(loss_type)

    itemsize = jnp.dtype(logit.dtype).itemsize
    vmem_bytes = _tpu_vmem_bytes()
    # v5e/v6e (128 MiB VMEM) take ~8 MiB row tiles; v7x (64 MiB/TC) stays ~4 MiB.
    tile_cap = 8 * _MIB if vmem_bytes >= 128 * _MIB else 4 * _MIB
    vmem_limit = int(min(100 * _MIB, (vmem_bytes * 4) // 5))

    if tile_rows is None:
        tm, ragged = _pick_tile_rows(n, itemsize, tile_cap)
    else:
        tm = int(tile_rows)
        assert tm % 8 == 0 or tm == n, "tile_rows must be sublane-aligned (x8)"
        ragged = (n % tm) != 0
    num_tiles = pl.cdiv(n, tm)

    # Diagonal slab (second view of logit) only when its (TM, TM) block is a
    # legal TPU tile; otherwise the kernel falls back to a full-row select.
    use_diag_slab = (tm % 128 == 0) or (tm == n and not ragged)

    if compute_dtype is None:
        # TODO(synk): v5e has no bf16 VPU/EUP; detect chip generation and keep
        # float32 compute there (bf16 is still correct, just not faster).
        compute_dtype = jnp.bfloat16 if logit.dtype == jnp.bfloat16 else jnp.float32

    kernel = functools.partial(
        _loss_kernel, loss_type=loss_type, compute_dtype=compute_dtype,
        use_diag_slab=use_diag_slab, ragged=ragged, n_valid=n)

    in_specs = [pl.BlockSpec((tm, n), lambda i: (i, 0))]
    operands = [logit]
    if use_diag_slab:
        in_specs.append(pl.BlockSpec((tm, tm), lambda i: (i, i)))
        operands.append(logit)

    cost = pl.CostEstimate(
        flops=8 * n * n,
        transcendentals=_TRANSCENDENTALS_PER_ELEM[loss_type] * n * n,
        bytes_accessed=itemsize * n * n
        + (itemsize * n * tm if use_diag_slab else 0)
        + 4 * num_tiles * 8 * 128,
    )

    partials = pl.pallas_call(
        kernel,
        out_shape=jax.ShapeDtypeStruct((num_tiles, 8, 128), jnp.float32),
        grid=(num_tiles,),
        in_specs=in_specs,
        out_specs=pl.BlockSpec((1, 8, 128), lambda i: (i, 0, 0)),
        compiler_params=pltpu.CompilerParams(
            dimension_semantics=("parallel",),   # independent per-tile partials
            vmem_limit_bytes=vmem_limit,
        ),
        cost_estimate=cost,
    )(*operands)

    total = jnp.sum(partials[:, 0, 0])
    n_f = jnp.float32(n)

    if loss_type == "TOP1":
        return total / (n_f * n_f)
    if loss_type == "BPR":
        return -(total / (n_f * n_f))
    if loss_type == "TOP1-max":
        return total / (n_f * n_f)
    if loss_type == "BPR-max":
        return -jnp.log(total / (n_f * n_f))
    if loss_type == "XE":
        return total / n_f
    raise NotImplementedError(loss_type)


# ---------------------------------------------------------------------------
# pure-JAX reference (mirrors the PyTorch spec exactly)
# ---------------------------------------------------------------------------
def _loss_ref(logit, loss_type):
    x = logit.astype(jnp.float32)
    diag = jnp.diag(x)[:, None]
    if loss_type == "TOP1":
        return jnp.mean(jax.nn.sigmoid(x - diag) + jax.nn.sigmoid(x * x))
    if loss_type == "BPR":
        return -jnp.mean(jax.nn.log_sigmoid(diag - x))
    if loss_type == "TOP1-max":
        sm = jax.nn.softmax(x, axis=1)
        return jnp.mean(sm * (jax.nn.sigmoid(x - diag) + jax.nn.sigmoid(x * x)))
    if loss_type == "BPR-max":
        sm = jax.nn.softmax(x, axis=1)
        return -jnp.log(jnp.mean(sm * jax.nn.sigmoid(diag - x)))
    if loss_type == "XE":
        lse = jax.nn.logsumexp(x, axis=1)
        return jnp.mean(lse - diag[:, 0])
    raise NotImplementedError(loss_type)


if __name__ == "__main__":
    key = jax.random.PRNGKey(0)
    ALL = ("TOP1", "BPR", "TOP1-max", "BPR-max", "XE")
    ok = True

    def check(out, ref, tag, rtol, atol):
        global ok
        if not jnp.allclose(out, ref, rtol=rtol, atol=atol):
            ok = False
            print(f"MISMATCH {tag}: kernel={out} ref={ref}")

    # 1) multi-tile, non-slab diagonal path (N=32, 4 row tiles)
    logit32 = jax.random.normal(key, (32, 32), dtype=jnp.float32)
    for lt in ALL:
        out = jax.block_until_ready(loss_function(logit32, loss_type=lt, tile_rows=8))
        check(out, _loss_ref(logit32, lt), f"{lt} N=32 tm=8", 2e-3, 2e-3)

    # 2) auto tile-size path (picks >=2 tiles for megacore)
    out = jax.block_until_ready(loss_function(logit32, loss_type="TOP1"))
    check(out, _loss_ref(logit32, "TOP1"), "TOP1 N=32 auto", 2e-3, 2e-3)

    # 3) multi-tile diagonal-slab path (TM=128 lane-aligned slab BlockSpec)
    logit256 = jax.random.normal(jax.random.PRNGKey(1), (256, 256), dtype=jnp.float32)
    for lt in ("TOP1-max", "BPR", "XE"):
        out = jax.block_until_ready(loss_function(logit256, loss_type=lt, tile_rows=128))
        check(out, _loss_ref(logit256, lt), f"{lt} N=256 tm=128", 2e-3, 2e-3)

    # 4) ragged batch (N not a multiple of the tile) -> tail-row masking
    logit20 = jax.random.normal(jax.random.PRNGKey(2), (20, 20), dtype=jnp.float32)
    for lt in ("TOP1", "XE"):
        out = jax.block_until_ready(loss_function(logit20, loss_type=lt, tile_rows=8))
        check(out, _loss_ref(logit20, lt), f"{lt} N=20 ragged", 2e-3, 2e-3)

    # 5) bf16 input -> bf16 transcendentals, f32 accumulation (v6e/v7x path)
    logit_bf16 = logit32.astype(jnp.bfloat16)
    logit_bf16_f32 = logit_bf16.astype(jnp.float32)
    for lt in ("TOP1", "BPR-max"):
        out = jax.block_until_ready(loss_function(logit_bf16, loss_type=lt))
        check(out, _loss_ref(logit_bf16_f32, lt), f"{lt} bf16", 5e-2, 5e-2)

    if ok:
        print("KERNEL_OK")
</pallas_src>

<mosaic_0001>
module attributes {stable_mosaic.version = 11 : i64} {
  func.func @_loss_kernel(%arg0: i32, %arg1: memref<8x32xf32, #tpu.memory_space<vmem>>, %arg2: memref<1x8x128xf32, #tpu.memory_space<vmem>>) attributes {dimension_semantics = [#tpu.dimension_semantics<parallel>], iteration_bounds = array<i64: 4>, scalar_prefetch = 0 : i64, scratch_operands = 0 : i64, tpu.core_type = #tpu.core_type<tc>, window_params = [{transform_indices = @transform_0, window_bounds = array<i64: 8, 32>}, {transform_indices = @transform_1, window_bounds = array<i64: 1, 8, 128>}]} {
    %c0 = arith.constant 0 : index
    %c0_0 = arith.constant 0 : index
    %0 = vector.load %arg1[%c0, %c0_0] : memref<8x32xf32, #tpu.memory_space<vmem>>, vector<8x32xf32>
    %c8_i32 = arith.constant 8 : i32
    %1 = arith.muli %arg0, %c8_i32 : i32
    %2 = tpu.iota {dimensions = array<i32: 0>} : vector<8x32xi32>
    %3 = tpu.iota {dimensions = array<i32: 1>} : vector<8x32xi32>
    %4 = vector.broadcast %1 : i32 to vector<8x32xi32>
    %5 = arith.addi %2, %4 : vector<8x32xi32>
    %6 = arith.cmpi eq, %3, %5 : vector<8x32xi32>
    %cst = arith.constant 0.000000e+00 : f32
    %7 = vector.broadcast %cst : f32 to vector<8x32xf32>
    %8 = arith.select %6, %0, %7 : vector<8x32xi1>, vector<8x32xf32>
    %cst_1 = arith.constant dense<0.000000e+00> : vector<8xf32>
    %9 = vector.multi_reduction <add>, %8, %cst_1 [1] : vector<8x32xf32> to vector<8xf32>
    %10 = vector.shape_cast %9 : vector<8xf32> to vector<8x1xf32>
    %11 = vector.broadcast %10 : vector<8x1xf32> to vector<8x32xf32>
    %12 = arith.subf %0, %11 : vector<8x32xf32>
    %cst_2 = arith.constant 5.000000e-01 : f32
    %13 = vector.broadcast %cst_2 : f32 to vector<8x32xf32>
    %14 = arith.mulf %13, %12 : vector<8x32xf32>
    %15 = math.tanh %14 : vector<8x32xf32>
    %cst_3 = arith.constant 1.000000e+00 : f32
    %16 = vector.broadcast %cst_3 : f32 to vector<8x32xf32>
    %17 = arith.addf %15, %16 : vector<8x32xf32>
    %cst_4 = arith.constant 5.000000e-01 : f32
    %18 = vector.broadcast %cst_4 : f32 to vector<8x32xf32>
    %19 = arith.mulf %18, %17 : vector<8x32xf32>
    %20 = arith.mulf %0, %0 : vector<8x32xf32>
    %cst_5 = arith.constant 5.000000e-01 : f32
    %21 = vector.broadcast %cst_5 : f32 to vector<8x32xf32>
    %22 = arith.mulf %21, %20 : vector<8x32xf32>
    %23 = math.tanh %22 : vector<8x32xf32>
    %cst_6 = arith.constant 1.000000e+00 : f32
    %24 = vector.broadcast %cst_6 : f32 to vector<8x32xf32>
    %25 = arith.addf %23, %24 : vector<8x32xf32>
    %cst_7 = arith.constant 5.000000e-01 : f32
    %26 = vector.broadcast %cst_7 : f32 to vector<8x32xf32>
    %27 = arith.mulf %26, %25 : vector<8x32xf32>
    %28 = arith.addf %19, %27 : vector<8x32xf32>
    %29 = vector.shape_cast %28 : vector<8x32xf32> to vector<1x8x32xf32>
    %cst_8 = arith.constant dense<0.000000e+00> : vector<1xf32>
    %30 = vector.multi_reduction <add>, %29, %cst_8 [1, 2] : vector<1x8x32xf32> to vector<1xf32>
    %31 = vector.shape_cast %30 : vector<1xf32> to vector<1x1x1xf32>
    %32 = vector.extract %31[0, 0, 0] : f32 from vector<1x1x1xf32>
    %33 = vector.broadcast %32 : f32 to vector<1x8x128xf32>
    %c0_9 = arith.constant 0 : index
    %c0_10 = arith.constant 0 : index
    %c0_11 = arith.constant 0 : index
    %34 = vector.load %arg2[%c0_9, %c0_10, %c0_11] : memref<1x8x128xf32, #tpu.memory_space<vmem>>, vector<1x8x128xf32>
    tpu.vector_store %arg2[%c0_9, %c0_10, %c0_11], %33 {strides = array<i32>} : memref<1x8x128xf32, #tpu.memory_space<vmem>>, vector<1x8x128xf32>,
    return
  }
  func.func @transform_0(%arg0: i32) -> (i32, i32) {
    %c0_i32 = arith.constant 0 : i32
    %c0_i32_0 = arith.constant 0 : i32
    return %arg0, %c0_i32 : i32, i32
  }
  func.func @transform_1(%arg0: i32) -> (i32, i32, i32) {
    %c0_i32 = arith.constant 0 : i32
    %c0_i32_0 = arith.constant 0 : i32
    %c0_i32_1 = arith.constant 0 : i32
    return %arg0, %c0_i32, %c0_i32_0 : i32, i32, i32
  }
}

</mosaic_0001>

<bundles_post_ra>
// kernel: tpu_custom_call.1
= control target key start
LH: loop header
LB: loop body
LE: loop exit
PB: predicated region body
PF: predicated region fallthrough
CT: control target
= control target key end

     0   :  { %6 = vsyncpa [#allocation3], 0  ;;  %s594_s0 = inlined_call_operand.hbm [shape: f32[32,32], index: 0, kind: input, shape index: {}]   ;;  %s595_s1 = inlined_call_operand.hbm [shape: f32[4,8,128], index: 1, kind: output, shape index: {}]  }
   0x1   :  { %8 = vsyncpa [#allocation3 + $0x1], 0 }
   0x2   :  { %9 = vsyncpa [#allocation4], 0 }
   0x3   :  { %11 = vsyncpa [#allocation4 + $0x1], 0  ;;  %s428_s6 = smov 0   ;;  %s430_s7 = smov 0  }
   0x4   :  { %s432_s8 = smov 0   ;;  %s434_s9 = smov 0  }
   0x5 LB: > { %s449_s10 = sadd.s32 4294967295, %s414_s9   ;;  %s253_s11 = sadd.s32 4294967294, %s414_s9   ;;  %s414_s9 = sphi %s434_s9, %s609_s9   ;;  %s410_s8 = sphi %s432_s8, %s608_s8   ;;  %s406_s7 = sphi %s430_s7, %s607_s7   ;;  %s402_s6 = sphi %s428_s6, %s606_s6  }
   0x6   : > { %s453_s12 = sadd.s32 1, %s414_s9   ;;  %s24_s13 = sadd.s32 1, %s410_s8 }
   0x7   : > { %s21_s14 = ssub.s32 %s414_s9, %s453_s12  ;;  %p31_p0 = scmp.ne.s32.totalorder %s410_s8, %s406_s7 }
   0x8   : > { %p22_p1 = scmp.eq.s32.totalorder %s21_s14, 0  ;;  %p32_p2 = scmp.eq.s32.totalorder %s414_s9, 0 }
   0x9   : > { %p37_p3 = scmp.ne.s32.totalorder %s406_s7, %s402_s6  ;;  %p38_p4 = scmp.eq.s32.totalorder %s449_s10, 0 }
   0xa   : > { %s465_s15 = scalar_select %p22_p1, %s410_s8, %s24_s13  }
   0xb   : > { %p467_p5 = por %p32_p2, %p31_p0  ;;  %p471_p6 = por %p38_p4, %p37_p3 }
   0xc   : > { %p61_p7 = scmp.eq.s32.totalorder %s449_s10, 3  ;;  %p67_p8 = scmp.eq.s32.totalorder %s253_s11, 3 }
   0xd   : > { %p280_p9 = scmp.lt.s32.totalorder %s414_s9, 4  ;;  %s87_s20 = sand.u32 1, %s410_s8  }
   0xe   : > { %p477_p10 = por %p61_p7, %p31_p0  ;;  %p481_p11 = por %p67_p8, %p37_p3 }
   0xf   : > { %s257_s21 = sshll.u32 %s414_s9, 7  ;;  %s256_s22 = sshll.u32 %s87_s20, 3 }
  0x10   : > { %s599_s18 = scalar_select %p477_p10, 1, 0 }
  0x11   : > { %s600_s19 = scalar_select %p481_p11, 1, 0 }
  0x12   : > { %s490_s25 = scalar_lea.hbm %s594_s0, %s257_s21  ;;  %s91_s26 = scalar_lea.vmem [#allocation2], %s256_s22 }
  0x13   : > { %s98_s27 = sshll.u32 %s91_s26, 4  ;;  %p494_p12 = pnand %p280_p9, %p467_p5  ;;  %s498_s27 = int_to_ptr.vmem [resolvable:$true] %s98_s27 }
  0x14   : > { %s88_s29 = scalar_lea.sflag [#allocation3], %s87_s20  ;;  %s318_s30 = scalar_lea.hbm %s490_s25, 128 }
  0x15   : > { %p319_p1 = scmp.ne.s32.totalorder %s490_s25, %s318_s30  ;;  %p320_p2 = pneg %p494_p12 }
  0x16   : > { %s323_s4 = scalar_lea.hbm %s594_s0, 512  ;;  %p324_p5 = scmp.lt.u32.totalorder %s490_s25, %s594_s0 }
  0x17   : > { %p321_p3 = pnand %p320_p2, %p319_p1  ;;  %p325_p7 = scmp.lt.u32.totalorder %s323_s4, %s318_s30 }
  0x18   : > { %p327_p9 = scmp.lt.u32.totalorder %s318_s30, %s490_s25 }
  0x19   : > { %p322_p4 = pneg %p321_p3  ;;  %p326_p8 = por %p325_p7, %p324_p5 }
  0x1b   : > { %p328_p13 = por %p327_p9, %p326_p8 }
  0x1d   : > { %p329_p0 = pnand %p328_p13, %p322_p4 }
  0x1f   : > { %332 = shalt.err (!%p329_p0)
}
  0x20   : > { %s333_s13 = scalar_lea.vmem %s498_s27, 128  ;;  %s416_s14 = smov [#allocation2]  }
  0x21   : > { %p334_p1 = scmp.ne.s32.totalorder %s498_s27, %s333_s13  ;;  %s338_s16 = sshll.u32 %s416_s14, 4  ;;  %s339_s16 = int_to_ptr.vmem [resolvable:$false] %s338_s16 }
  0x22   : > { %s340_s20 = scalar_lea.vmem %s339_s16, 256  ;;  %p341_p10 = scmp.lt.s32.totalorder %s498_s27, %s339_s16 }
  0x23   : > { %p336_p3 = pnand %p334_p1, %p320_p2  ;;  %p342_p5 = scmp.lt.s32.totalorder %s340_s20, %s333_s13 }
  0x25   : > { %p337_p11 = pneg %p336_p3  ;;  %p343_p7 = por %p342_p5, %p341_p10 }
  0x27   : > { %p344_p8 = pnand %p343_p7, %p337_p11 }
  0x29   : > { %347 = shalt.err (!%p344_p8)
}
  0x2a   : > { %275 = dma.hbm_to_vmem [thread:$0]  (!%p494_p12), %s490_s25, 128, %s498_s27, %s88_s29  }
  0x2b   : > { %p602_p13 = scmp.lt.s32.totalorder %s414_s9, 5  ;;  %p603_p0 = scmp.ge.s32.totalorder %s414_s9, 1 }
  0x2d   : > { %p104_p2 = pnand %p603_p0, %p602_p13 }
  0x2e   : > { %s532_s21 = sand.u32 (!%p104_p2), 1, %s406_s7  }
  0x2f   : > { %107 = sbr.rel (%p104_p2) target bundleno = 447 (0x1bf), region = 24  ;;  %s259_s22 = sshll.u32 (!%p104_p2), %s532_s21, 3 }
  0x30   : > { %s110_s23 = scalar_lea.sflag (!%p104_p2), [#allocation3], %s532_s21  ;;  %s113_s24 = scalar_lea.vmem (!%p104_p2), [#allocation2], %s259_s22 }
  0x36   : > { %393 = dma.done.wait (%p471_p6), %s110_s23, 128  }
  0x37   : > { %395 = vsyncadd (%p471_p6), %s110_s23, 4294967168  ;;  %s261_s25 = sshll.u32 %s449_s10, 3  ;;  %v134_v0 = vlaneseq  ;;  %vm142_vm1 = vcmask 261120   ;;  %v132_v5 = vld [vmem:[%s113_s24] sm:$0xff]  ;;  %s131_s17 = scalar_lea.vmem [#allocation5], %s259_s22 }
  0x38   : > { %v138_v1 = vstv %s261_s25  ;;  %v151_v8 = vmul.f32 %v132_v5, %v132_v5  ;;  %s183_s26 = sshll.u32 %s131_s17, 4  ;;  %s263_s27 = sshll.u32 %s449_s10, 7  ;;  %s548_s26 = int_to_ptr.vmem [resolvable:$true] %s183_s26 }
  0x39   : > { %v135_v2 = vshrl.u32 %v134_v0, 7  ;;  %v137_v3 = vand.u32 127, %v134_v0  ;;  %s553_s2 = scalar_lea.hbm %s595_s1, %s263_s27  ;;  %s170_s3 = scalar_lea.sflag [#allocation4], %s532_s21 }
  0x3a   : > { %v152_v9 = vmul.f32 0.5, %v151_v8  ;;  %s348_s4 = scalar_lea.vmem %s548_s26, 128  ;;  %p604_p10 = scmp.ne.s32.totalorder %s599_s18, 0 }
  0x3b   : > { %v139_v4 = vadd.s32 %v138_v1, %v135_v2  ;;  %p349_p6 = scmp.ne.s32.totalorder %s548_s26, %s348_s4  ;;  %s417_s10 = smov [#allocation5]  }
  0x3c   : > { %314 = vtanh.f32 %v152_v9  ;;  %s352_s5 = sshll.u32 %s417_s10, 4  ;;  %s353_s5 = int_to_ptr.vmem [resolvable:$false] %s352_s5 }
  0x3d   : > { %vm140_vm0 = vcmp.eq.s32.totalorder %v137_v3, %v139_v4  ;;  %p350_p11 = pnand %p349_p6, %p604_p10  ;;  %s354_s11 = scalar_lea.vmem %s353_s5, 256 }
  0x3e   : > { %v141_v6 = vsel %vm140_vm0, %v132_v5, 0.0  ;;  %p355_p4 = scmp.lt.s32.totalorder %s548_s26, %s353_s5  ;;  %p356_p9 = scmp.lt.s32.totalorder %s354_s11, %s348_s4 }
  0x3f   : > { %v143_v7 = vsel %vm142_vm1, %v141_v6, 0.0  ;;  %p351_p12 = pneg %p350_p11 }
  0x40   : > { %144 = vadd.xlane.f32.xlu0 %v143_v7  ;;  %p357_p1 = por %p356_p9, %p355_p4 }
  0x42   : > { %p358_p3 = pnand %p357_p1, %p351_p12 }
  0x46   : > { %v315_v13 = vpop.eup %314 }
  0x47   : > { %v154_v14 = vadd.f32 1.0, %v315_v13 }
  0x49   : > { %v155_v17 = vmul.f32 0.5, %v154_v14 }
  0xcd   : > { %v145_v10 = vpop.xlane.xlu0 %144 }
  0xce   : > { %v146_v11 = vsub.f32 %v132_v5, %v145_v10 }
  0xd0   : > { %v147_v12 = vmul.f32 0.5, %v146_v11 }
  0xd2   : > { %316 = vtanh.f32 %v147_v12 }
  0xdc   : > { %v317_v15 = vpop.eup %316 }
  0xdd   : > { %v149_v16 = vadd.f32 1.0, %v317_v15 }
  0xdf   : > { %v150_v18 = vmul.f32 0.5, %v149_v16 }
  0xe1   : > { %v156_v19 = vadd.f32 %v155_v17, %v150_v18 }
  0xe3   : > { %v157_v20 = vsel %vm142_vm1, %v156_v19, 0.0 }
  0xe4   : > { %158 = vadd.xlane.f32.xlu0 %v157_v20 }
 0x171   : > { %v159_v21 = vpop.xlane.xlu0 %158 }
 0x172   : > { %v160_v22 = vrot.slane %v159_v21, 4 }
 0x174   : > { %v161_v23 = vadd.f32 %v160_v22, %v159_v21 }
 0x176   : > { %v162_v24 = vrot.slane %v161_v23, 2 }
 0x178   : > { %v163_v25 = vadd.f32 %v162_v24, %v161_v23 }
 0x17a   : > { %v164_v26 = vrot.slane %v163_v25, 1 }
 0x17c   : > { %v165_v27 = vadd.f32 %v164_v26, %v163_v25 }
 0x17e   : > { %266 = vpush %v165_v27 }
 0x1af   : > { %s267_s28 = spop %266 }
 0x1b0   : > { %v167_v28 = vstv %s267_s28 }
 0x1b1   : > { %168 = vst [vmem:[%s131_s17] sm:$0xff] %v167_v28 }
 0x1b2   : > { %361 = shalt.err (!%p358_p3)
}
 0x1b3   : > { %s362_s13 = scalar_lea.hbm %s553_s2, 128  ;;  %s366_s20 = scalar_lea.hbm %s595_s1, 512 }
 0x1b4   : > { %p363_p5 = scmp.ne.s32.totalorder %s553_s2, %s362_s13  ;;  %p367_p13 = scmp.lt.u32.totalorder %s553_s2, %s595_s1 }
 0x1b5   : > { %p368_p0 = scmp.lt.u32.totalorder %s366_s20, %s362_s13  ;;  %p370_p6 = scmp.lt.u32.totalorder %s362_s13, %s553_s2 }
 0x1b6   : > { %p364_p7 = pnand %p363_p5, %p604_p10 }
 0x1b7   : > { %p369_p2 = por %p368_p0, %p367_p13 }
 0x1b8   : > { %p365_p8 = pneg %p364_p7 }
 0x1b9   : > { %p371_p11 = por %p370_p6, %p369_p2 }
 0x1bb   : > { %p372_p12 = pnand %p371_p11, %p365_p8 }
 0x1bd   : > { %375 = shalt.err (!%p372_p12)
}
 0x1be   : > { %270 = dma.vmem_to_hbm [thread:$0]  (%p604_p10), %s548_s26, 128, %s553_s2, %s170_s3  }
 0x1bf PF: > { %p281_p4 = scmp.ge.s32.totalorder %s414_s9, 2  ;;  %s195_s23 = sand.u32 1, %s402_s6  }
 0x1c0   : > { %p605_p9 = scmp.ne.s32.totalorder %s600_s19, 0  ;;  %s196_s24 = scalar_lea.sflag [#allocation4], %s195_s23 }
 0x1c2   : > { %p277_p1 = pnand %p281_p4, %p605_p9 }
 0x1c4   : > { %397 = dma.done.wait (!%p277_p1), %s196_s24, 128  }
 0x1c5   : > { %399 = vsyncadd (!%p277_p1), %s196_s24, 4294967168  ;;  %p14_p3 = scmp.ge.s32.totalorder %s453_s12, 6   ;;  %s606_s6 = smov %s406_s7 }
 0x1c6   : > { %s607_s7 = smov %s410_s8  ;;  %s608_s8 = smov %s465_s15 }
 0x1c7   : > { %s609_s9 = smov %s453_s12  ;;  %16 = sbr.rel (!%p14_p3) target bundleno = 5 (0x5), region = 69 }
 0x1ce   :  { %201 = vsyncpa [#allocation3], 1 }
 0x1cf   :  { %203 = vsyncpa [#allocation3 + $0x1], 1 }
 0x1d0   :  { %204 = vsyncpa [#allocation4], 1 }
 0x1d1   :  { %206 = vsyncpa [#allocation4 + $0x1], 1 }

</bundles_post_ra>
